<compile_context>
chip_gen: v5e
topology: v5e:2x2
jax: 0.10.0
libtpu: 0.0.40
codegen_flags: <defaults>
</compile_context>

<pallas_src>
import functools

import jax
import jax.numpy as jnp
from jax import lax
from jax.experimental import pallas as pl
from jax.experimental.pallas import tpu as pltpu


def _dwsep_kernel(xa_ref, xh_ref, dw_ref, pw_ref, bias_ref, o_ref, *,
                  TH, C_in, K, WC_in):
    # xa_ref  : (TH, Wp*C_in)     main strip of the zero-padded input (lane = w*C_in + c)
    # xh_ref  : (8,  Wp*C_in)     halo rows directly below the strip (first K-1 used)
    # dw_ref  : (K*K, W*C_in)     depthwise taps, row kh*K+kw, tiled W times along lanes
    # pw_ref  : (W*C_in, W*C_out) block-diagonal pointwise weights (BN scale folded), bf16
    # bias_ref: (1, W*C_out)      folded BN bias (f32)
    # o_ref   : (TH, W*C_out)     lane-dense output strip
    halo = xh_ref[pl.ds(0, K - 1), :]
    strip = jnp.concatenate([xa_ref[...], halo], axis=0).astype(jnp.float32)  # (TH+K-1, Wp*C_in)

    dwk = dw_ref[...].astype(jnp.float32)                   # (K*K, W*C_in), loaded once

    # K lane-shifted views of the whole strip (a shift of kw along W is a shift of
    # kw*C_in lanes in the packed layout) -- hoisted out of the kh loop.
    shifted = [strip[:, kw * C_in: kw * C_in + WC_in] for kw in range(K)]

    # Depthwise KxK accumulation on the VPU in f32 (portable across v5e/v6e/v7x).
    # TODO(synk): a bf16 VPU path on v6e/v7x would double depthwise throughput.
    acc = jnp.zeros((TH, WC_in), dtype=jnp.float32)
    for kh in range(K):
        for kw in range(K):
            acc = acc + shifted[kw][kh:kh + TH, :] * dwk[kh * K + kw][None, :]

    # Pointwise 1x1 conv (+ BN scale) as one bf16 MXU matmul with f32 accumulate.
    # The block-diagonal weight keeps the output lane-packed (lane = w*C_out + co).
    y = jnp.dot(acc.astype(jnp.bfloat16), pw_ref[...],
                preferred_element_type=jnp.float32)          # (TH, W*C_out)
    y = y + bias_ref[...]                                    # folded BN bias
    o_ref[...] = jnp.maximum(y, 0.0).astype(o_ref.dtype)


def _pick_tile_h(H, target):
    """Largest multiple-of-8 divisor of H that does not exceed `target`."""
    best, th = 0, 8
    while th <= min(H, target):
        if H % th == 0:
            best = th
        th += 8
    return best


def depthwise_separable_conv(x_nchw, dw_w, pw_w, gamma, beta,
                             running_mean, running_var, eps=1e-5, tile_h=128):
    """x_nchw: (N, C_in, H, W) float32.  Returns (N, C_out, H, W) float32."""
    N, C_in, H, W = x_nchw.shape
    K = dw_w.shape[-1]                 # dw_w: (C_in, 1, K, K)   (PyTorch layout)
    C_out = pw_w.shape[0]              # pw_w: (C_out, C_in, 1, 1)
    pad = (K - 1) // 2                 # 'same' padding, stride 1
    # TODO(synk): only odd K with stride=1 (the module defaults) are handled here.
    if K % 2 != 1 or K - 1 > 8:
        raise NotImplementedError("only odd kernel sizes with K-1 <= 8 are supported")
    if H % 8 != 0:
        # TODO(synk): pad H up to a multiple of 8 (sublane) for the halo tiling.
        raise NotImplementedError("H must be a multiple of 8")

    TH = _pick_tile_h(H, tile_h)       # 8-aligned H strip, as large as reasonable
    Wp = W + 2 * pad
    WC_in, WC_out = W * C_in, W * C_out
    # The lane-packed block-diagonal pointwise weight is only the right call for
    # small W*C (like this module's toy sizes).
    # TODO(synk): for large channel counts (C_in/C_out >= ~64) switch to a
    # channels-on-lanes (TH*W, C_in) @ (C_in, C_out) pointwise matmul with W-tiling.
    if WC_in > 4096 or WC_out > 4096:
        raise NotImplementedError("lane-packed pointwise path only supports small W*C")

    # ---- layout plumbing + BN folding (plain JAX, outside the kernel) ----
    # TODO(synk): in an NHWC end-to-end model the transposes (and the pad, via
    # in-kernel boundary masking) could be dropped to save HBM round trips.
    x_nhwc = jnp.transpose(x_nchw, (0, 2, 3, 1)).astype(jnp.float32)
    # Top pad = `pad` rows; bottom pad sized so the 8-row halo block of the last
    # strip stays in bounds (>= H + 8 rows total).  W gets `pad` columns each side.
    Hp_pad = H + max(2 * pad, 8)
    x_pad = jnp.pad(x_nhwc, ((0, 0), (pad, Hp_pad - H - pad), (pad, pad), (0, 0)))
    x_packed = x_pad.reshape(N, Hp_pad, Wp * C_in)           # lane = w*C_in + c

    # Depthwise weights (C_in,1,K,K) -> rows (kh*K+kw), tiled W times along lanes.
    dw_kkc = jnp.transpose(dw_w[:, 0, :, :], (1, 2, 0)).astype(jnp.float32)     # (K,K,Cin)
    dw_flat = jnp.tile(dw_kkc[:, :, None, :], (1, 1, W, 1)).reshape(K * K, WC_in)

    # Eval-mode BatchNorm folded into pointwise scale / bias.
    # TODO(synk): PyTorch training-mode batch statistics are not implemented.
    scale = (gamma / jnp.sqrt(running_var + eps)).astype(jnp.float32)           # (Cout,)
    bias = (beta - running_mean * scale).astype(jnp.float32)                    # (Cout,)

    # Pointwise weights (C_out,C_in,1,1) -> (C_in,C_out), fold BN scale, expand to
    # a block-diagonal (W*C_in, W*C_out) matrix so the matmul output is already in
    # the packed lane layout.  Shipped in bf16 for the bf16-native MXU.
    pw_mat = jnp.transpose(pw_w[:, :, 0, 0], (1, 0)).astype(jnp.float32)        # (Cin,Cout)
    pw_block = jnp.kron(jnp.eye(W, dtype=jnp.float32),
                        pw_mat * scale[None, :]).astype(jnp.bfloat16)           # (W*Cin,W*Cout)
    bias_tile = jnp.tile(bias, W).reshape(1, WC_out)                            # (1, W*Cout)

    kernel = functools.partial(_dwsep_kernel, TH=TH, C_in=C_in, K=K, WC_in=WC_in)

    hb = TH // 8        # halo block-index stride (halo block is 8 rows)
    out_packed = pl.pallas_call(
        kernel,
        out_shape=jax.ShapeDtypeStruct((N, H, WC_out), jnp.float32),
        grid=(H // TH, N),
        in_specs=[
            # Main strip: padded rows [t*TH, t*TH + TH).
            pl.BlockSpec((None, TH, Wp * C_in), lambda t, n: (n, t, 0)),
            # 8-row halo block starting at padded row t*TH + TH (same array, shifted).
            pl.BlockSpec((None, 8, Wp * C_in), lambda t, n: (n, (t + 1) * hb, 0)),
            pl.BlockSpec((K * K, WC_in), lambda t, n: (0, 0)),
            pl.BlockSpec((WC_in, WC_out), lambda t, n: (0, 0)),
            pl.BlockSpec((1, WC_out), lambda t, n: (0, 0)),
        ],
        # Lane-dense output strips ((TH, 128) for the test shapes).
        # TODO(synk): pad W*C_out up to a multiple of 128 for general shapes.
        out_specs=pl.BlockSpec((None, TH, WC_out), lambda t, n: (n, t, 0)),
        compiler_params=pltpu.CompilerParams(
            dimension_semantics=("parallel", "parallel")),
    )(x_packed, x_packed, dw_flat, pw_block, bias_tile)

    # Unpack lanes -> (N,H,W,Cout) -> NCHW (boundary layout only, outside kernel).
    out_nhwc = out_packed.reshape(N, H, W, C_out)
    return jnp.transpose(out_nhwc, (0, 3, 1, 2))


def _reference(x_nchw, dw_w, pw_w, gamma, beta, rmean, rvar, eps=1e-5):
    """Plain-JAX reference (eval-mode BN) in NHWC, returned as NCHW."""
    N, C_in, H, W = x_nchw.shape
    x = jnp.transpose(x_nchw, (0, 2, 3, 1))
    dw_hwio = jnp.transpose(dw_w, (2, 3, 1, 0))              # (K,K,1,Cin)
    y = lax.conv_general_dilated(
        x, dw_hwio, window_strides=(1, 1), padding=((1, 1), (1, 1)),
        dimension_numbers=("NHWC", "HWIO", "NHWC"), feature_group_count=C_in)
    pw_hwio = jnp.transpose(pw_w, (2, 3, 1, 0))              # (1,1,Cin,Cout)
    y = lax.conv_general_dilated(
        y, pw_hwio, window_strides=(1, 1), padding="VALID",
        dimension_numbers=("NHWC", "HWIO", "NHWC"))
    scale = gamma / jnp.sqrt(rvar + eps)
    y = y * scale + (beta - rmean * scale)
    y = jnp.maximum(y, 0.0)
    return jnp.transpose(y, (0, 3, 1, 2))


if __name__ == "__main__":
    key = jax.random.PRNGKey(0)
    kx, kdw, kpw, kg, kb, km, kv = jax.random.split(key, 7)

    N, C_in, C_out, H, W, K = 2, 4, 8, 16, 16, 3

    x = jax.random.normal(kx, (N, C_in, H, W), dtype=jnp.float32)
    dw_w = jax.random.normal(kdw, (C_in, 1, K, K), dtype=jnp.float32) * 0.2
    pw_w = jax.random.normal(kpw, (C_out, C_in, 1, 1), dtype=jnp.float32) * 0.2
    gamma = 1.0 + 0.1 * jax.random.normal(kg, (C_out,), dtype=jnp.float32)
    beta = 0.1 * jax.random.normal(kb, (C_out,), dtype=jnp.float32)
    rmean = 0.05 * jax.random.normal(km, (C_out,), dtype=jnp.float32)
    rvar = jnp.abs(1.0 + 0.1 * jax.random.normal(kv, (C_out,), dtype=jnp.float32))

    ref = _reference(x, dw_w, pw_w, gamma, beta, rmean, rvar)

    # Default tiling (TH = 16 here -> one strip per image; halo hits the bottom pad).
    out = depthwise_separable_conv(x, dw_w, pw_w, gamma, beta, rmean, rvar)
    out = jax.block_until_ready(out)
    assert out.shape == (N, C_out, H, W)
    # bf16 MXU operands -> slightly looser tolerance than the pure-f32 path.
    assert jnp.allclose(out, ref, atol=3e-2, rtol=3e-2), float(
        jnp.max(jnp.abs(out - ref)))

    # Smaller strips (TH = 8) so the halo also crosses a real strip boundary.
    out2 = depthwise_separable_conv(x, dw_w, pw_w, gamma, beta, rmean, rvar,
                                    tile_h=8)
    out2 = jax.block_until_ready(out2)
    assert jnp.allclose(out2, ref, atol=3e-2, rtol=3e-2), float(
        jnp.max(jnp.abs(out2 - ref)))

    print("KERNEL_OK")
</pallas_src>

<mosaic_0001>
module attributes {stable_mosaic.version = 11 : i64} {
  func.func @_dwsep_kernel(%arg0: i32, %arg1: i32, %arg2: memref<1x16x72xf32, #tpu.memory_space<vmem>>, %arg3: memref<1x8x72xf32, #tpu.memory_space<vmem>>, %arg4: memref<9x64xf32, #tpu.memory_space<vmem>>, %arg5: memref<64x128xbf16, #tpu.memory_space<vmem>>, %arg6: memref<1x128xf32, #tpu.memory_space<vmem>>, %arg7: memref<1x16x128xf32, #tpu.memory_space<vmem>>) attributes {dimension_semantics = [#tpu.dimension_semantics<parallel>, #tpu.dimension_semantics<parallel>], iteration_bounds = array<i64: 1, 2>, scalar_prefetch = 0 : i64, scratch_operands = 0 : i64, tpu.core_type = #tpu.core_type<tc>, window_params = [{transform_indices = @transform_0, window_bounds = array<i64: 1, 16, 72>}, {transform_indices = @transform_1, window_bounds = array<i64: 1, 8, 72>}, {pipeline_mode = #tpu.pipeline_mode<synchronous>, transform_indices = @transform_2, window_bounds = array<i64: 9, 64>}, {pipeline_mode = #tpu.pipeline_mode<synchronous>, transform_indices = @transform_3, window_bounds = array<i64: 64, 128>}, {pipeline_mode = #tpu.pipeline_mode<synchronous>, transform_indices = @transform_4, window_bounds = array<i64: 1, 128>}, {transform_indices = @transform_5, window_bounds = array<i64: 1, 16, 128>}]} {
    %c0 = arith.constant 0 : index
    %c0_0 = arith.constant 0 : index
    %c0_1 = arith.constant 0 : index
    %0 = vector.load %arg3[%c0, %c0_0, %c0_1] : memref<1x8x72xf32, #tpu.memory_space<vmem>>, vector<1x2x72xf32>
    %1 = vector.shape_cast %0 : vector<1x2x72xf32> to vector<2x72xf32>
    %c0_2 = arith.constant 0 : index
    %c0_3 = arith.constant 0 : index
    %c0_4 = arith.constant 0 : index
    %2 = vector.load %arg2[%c0_2, %c0_3, %c0_4] : memref<1x16x72xf32, #tpu.memory_space<vmem>>, vector<1x16x72xf32>
    %3 = vector.shape_cast %2 : vector<1x16x72xf32> to vector<16x72xf32>
    %4 = tpu.concatenate %3, %1 in 0 : vector<16x72xf32>, vector<2x72xf32> -> vector<18x72xf32>
    %c0_5 = arith.constant 0 : index
    %c0_6 = arith.constant 0 : index
    %5 = vector.load %arg4[%c0_5, %c0_6] : memref<9x64xf32, #tpu.memory_space<vmem>>, vector<9x64xf32>
    %6 = vector.extract_strided_slice %4 {offsets = [0, 0], sizes = [18, 64], strides = [1, 1]} : vector<18x72xf32> to vector<18x64xf32>
    %7 = vector.extract_strided_slice %4 {offsets = [0, 4], sizes = [18, 64], strides = [1, 1]} : vector<18x72xf32> to vector<18x64xf32>
    %8 = vector.extract_strided_slice %4 {offsets = [0, 8], sizes = [18, 64], strides = [1, 1]} : vector<18x72xf32> to vector<18x64xf32>
    %cst = arith.constant 0.000000e+00 : f32
    %9 = vector.broadcast %cst : f32 to vector<16x64xf32>
    %10 = vector.extract_strided_slice %6 {offsets = [0, 0], sizes = [16, 64], strides = [1, 1]} : vector<18x64xf32> to vector<16x64xf32>
    %11 = vector.extract_strided_slice %5 {offsets = [0, 0], sizes = [1, 64], strides = [1, 1]} : vector<9x64xf32> to vector<1x64xf32>
    %12 = vector.shape_cast %11 : vector<1x64xf32> to vector<64xf32>
    %13 = vector.shape_cast %12 : vector<64xf32> to vector<1x64xf32>
    %14 = vector.broadcast %13 : vector<1x64xf32> to vector<16x64xf32>
    %15 = arith.mulf %10, %14 : vector<16x64xf32>
    %16 = arith.addf %9, %15 : vector<16x64xf32>
    %17 = vector.extract_strided_slice %7 {offsets = [0, 0], sizes = [16, 64], strides = [1, 1]} : vector<18x64xf32> to vector<16x64xf32>
    %18 = vector.extract_strided_slice %5 {offsets = [1, 0], sizes = [1, 64], strides = [1, 1]} : vector<9x64xf32> to vector<1x64xf32>
    %19 = vector.shape_cast %18 : vector<1x64xf32> to vector<64xf32>
    %20 = vector.shape_cast %19 : vector<64xf32> to vector<1x64xf32>
    %21 = vector.broadcast %20 : vector<1x64xf32> to vector<16x64xf32>
    %22 = arith.mulf %17, %21 : vector<16x64xf32>
    %23 = arith.addf %16, %22 : vector<16x64xf32>
    %24 = vector.extract_strided_slice %8 {offsets = [0, 0], sizes = [16, 64], strides = [1, 1]} : vector<18x64xf32> to vector<16x64xf32>
    %25 = vector.extract_strided_slice %5 {offsets = [2, 0], sizes = [1, 64], strides = [1, 1]} : vector<9x64xf32> to vector<1x64xf32>
    %26 = vector.shape_cast %25 : vector<1x64xf32> to vector<64xf32>
    %27 = vector.shape_cast %26 : vector<64xf32> to vector<1x64xf32>
    %28 = vector.broadcast %27 : vector<1x64xf32> to vector<16x64xf32>
    %29 = arith.mulf %24, %28 : vector<16x64xf32>
    %30 = arith.addf %23, %29 : vector<16x64xf32>
    %31 = vector.extract_strided_slice %6 {offsets = [1, 0], sizes = [16, 64], strides = [1, 1]} : vector<18x64xf32> to vector<16x64xf32>
    %32 = vector.extract_strided_slice %5 {offsets = [3, 0], sizes = [1, 64], strides = [1, 1]} : vector<9x64xf32> to vector<1x64xf32>
    %33 = vector.shape_cast %32 : vector<1x64xf32> to vector<64xf32>
    %34 = vector.shape_cast %33 : vector<64xf32> to vector<1x64xf32>
    %35 = vector.broadcast %34 : vector<1x64xf32> to vector<16x64xf32>
    %36 = arith.mulf %31, %35 : vector<16x64xf32>
    %37 = arith.addf %30, %36 : vector<16x64xf32>
    %38 = vector.extract_strided_slice %7 {offsets = [1, 0], sizes = [16, 64], strides = [1, 1]} : vector<18x64xf32> to vector<16x64xf32>
    %39 = vector.extract_strided_slice %5 {offsets = [4, 0], sizes = [1, 64], strides = [1, 1]} : vector<9x64xf32> to vector<1x64xf32>
    %40 = vector.shape_cast %39 : vector<1x64xf32> to vector<64xf32>
    %41 = vector.shape_cast %40 : vector<64xf32> to vector<1x64xf32>
    %42 = vector.broadcast %41 : vector<1x64xf32> to vector<16x64xf32>
    %43 = arith.mulf %38, %42 : vector<16x64xf32>
    %44 = arith.addf %37, %43 : vector<16x64xf32>
    %45 = vector.extract_strided_slice %8 {offsets = [1, 0], sizes = [16, 64], strides = [1, 1]} : vector<18x64xf32> to vector<16x64xf32>
    %46 = vector.extract_strided_slice %5 {offsets = [5, 0], sizes = [1, 64], strides = [1, 1]} : vector<9x64xf32> to vector<1x64xf32>
    %47 = vector.shape_cast %46 : vector<1x64xf32> to vector<64xf32>
    %48 = vector.shape_cast %47 : vector<64xf32> to vector<1x64xf32>
    %49 = vector.broadcast %48 : vector<1x64xf32> to vector<16x64xf32>
    %50 = arith.mulf %45, %49 : vector<16x64xf32>
    %51 = arith.addf %44, %50 : vector<16x64xf32>
    %52 = vector.extract_strided_slice %6 {offsets = [2, 0], sizes = [16, 64], strides = [1, 1]} : vector<18x64xf32> to vector<16x64xf32>
    %53 = vector.extract_strided_slice %5 {offsets = [6, 0], sizes = [1, 64], strides = [1, 1]} : vector<9x64xf32> to vector<1x64xf32>
    %54 = vector.shape_cast %53 : vector<1x64xf32> to vector<64xf32>
    %55 = vector.shape_cast %54 : vector<64xf32> to vector<1x64xf32>
    %56 = vector.broadcast %55 : vector<1x64xf32> to vector<16x64xf32>
    %57 = arith.mulf %52, %56 : vector<16x64xf32>
    %58 = arith.addf %51, %57 : vector<16x64xf32>
    %59 = vector.extract_strided_slice %7 {offsets = [2, 0], sizes = [16, 64], strides = [1, 1]} : vector<18x64xf32> to vector<16x64xf32>
    %60 = vector.extract_strided_slice %5 {offsets = [7, 0], sizes = [1, 64], strides = [1, 1]} : vector<9x64xf32> to vector<1x64xf32>
    %61 = vector.shape_cast %60 : vector<1x64xf32> to vector<64xf32>
    %62 = vector.shape_cast %61 : vector<64xf32> to vector<1x64xf32>
    %63 = vector.broadcast %62 : vector<1x64xf32> to vector<16x64xf32>
    %64 = arith.mulf %59, %63 : vector<16x64xf32>
    %65 = arith.addf %58, %64 : vector<16x64xf32>
    %66 = vector.extract_strided_slice %8 {offsets = [2, 0], sizes = [16, 64], strides = [1, 1]} : vector<18x64xf32> to vector<16x64xf32>
    %67 = vector.extract_strided_slice %5 {offsets = [8, 0], sizes = [1, 64], strides = [1, 1]} : vector<9x64xf32> to vector<1x64xf32>
    %68 = vector.shape_cast %67 : vector<1x64xf32> to vector<64xf32>
    %69 = vector.shape_cast %68 : vector<64xf32> to vector<1x64xf32>
    %70 = vector.broadcast %69 : vector<1x64xf32> to vector<16x64xf32>
    %71 = arith.mulf %66, %70 : vector<16x64xf32>
    %72 = arith.addf %65, %71 : vector<16x64xf32>
    %73 = arith.truncf %72 : vector<16x64xf32> to vector<16x64xbf16>
    %c0_7 = arith.constant 0 : index
    %c0_8 = arith.constant 0 : index
    %74 = vector.load %arg5[%c0_7, %c0_8] : memref<64x128xbf16, #tpu.memory_space<vmem>>, vector<64x128xbf16>
    %cst_9 = arith.constant dense<0.000000e+00> : vector<16x128xf32>
    %75 = tpu.matmul %73, %74, %cst_9 {dimension_numbers = #tpu.dot_dimension_numbers<[1], [0], [0], [1], [0, 0, 1, 1], [], []>} : vector<16x64xbf16>, vector<64x128xbf16>, vector<16x128xf32> -> vector<16x128xf32>
    %c0_10 = arith.constant 0 : index
    %c0_11 = arith.constant 0 : index
    %76 = vector.load %arg6[%c0_10, %c0_11] : memref<1x128xf32, #tpu.memory_space<vmem>>, vector<1x128xf32>
    %77 = vector.broadcast %76 : vector<1x128xf32> to vector<16x128xf32>
    %78 = arith.addf %75, %77 : vector<16x128xf32>
    %cst_12 = arith.constant 0.000000e+00 : f32
    %79 = vector.broadcast %cst_12 : f32 to vector<16x128xf32>
    %80 = arith.maximumf %78, %79 : vector<16x128xf32>
    %c0_13 = arith.constant 0 : index
    %c0_14 = arith.constant 0 : index
    %c0_15 = arith.constant 0 : index
    %81 = vector.load %arg7[%c0_13, %c0_14, %c0_15] : memref<1x16x128xf32, #tpu.memory_space<vmem>>, vector<1x16x128xf32>
    %82 = vector.shape_cast %81 : vector<1x16x128xf32> to vector<16x128xf32>
    %83 = vector.shape_cast %80 : vector<16x128xf32> to vector<1x16x128xf32>
    tpu.vector_store %arg7[%c0_13, %c0_14, %c0_15], %83 {strides = array<i32>} : memref<1x16x128xf32, #tpu.memory_space<vmem>>, vector<1x16x128xf32>,
    return
  }
  func.func @transform_0(%arg0: i32, %arg1: i32) -> (i32, i32, i32) {
    %c0_i32 = arith.constant 0 : i32
    %c0_i32_0 = arith.constant 0 : i32
    return %arg1, %arg0, %c0_i32 : i32, i32, i32
  }
  func.func @transform_1(%arg0: i32, %arg1: i32) -> (i32, i32, i32) {
    %c1_i32 = arith.constant 1 : i32
    %0 = arith.addi %arg0, %c1_i32 : i32
    %c2_i32 = arith.constant 2 : i32
    %1 = arith.muli %0, %c2_i32 : i32
    %c0_i32 = arith.constant 0 : i32
    %c0_i32_0 = arith.constant 0 : i32
    return %arg1, %1, %c0_i32 : i32, i32, i32
  }
  func.func @transform_2(%arg0: i32, %arg1: i32) -> (i32, i32) {
    %c0_i32 = arith.constant 0 : i32
    %c0_i32_0 = arith.constant 0 : i32
    %c0_i32_1 = arith.constant 0 : i32
    return %c0_i32, %c0_i32_0 : i32, i32
  }
  func.func @transform_3(%arg0: i32, %arg1: i32) -> (i32, i32) {
    %c0_i32 = arith.constant 0 : i32
    %c0_i32_0 = arith.constant 0 : i32
    %c0_i32_1 = arith.constant 0 : i32
    return %c0_i32, %c0_i32_0 : i32, i32
  }
  func.func @transform_4(%arg0: i32, %arg1: i32) -> (i32, i32) {
    %c0_i32 = arith.constant 0 : i32
    %c0_i32_0 = arith.constant 0 : i32
    %c0_i32_1 = arith.constant 0 : i32
    return %c0_i32, %c0_i32_0 : i32, i32
  }
  func.func @transform_5(%arg0: i32, %arg1: i32) -> (i32, i32, i32) {
    %c0_i32 = arith.constant 0 : i32
    %c0_i32_0 = arith.constant 0 : i32
    return %arg1, %arg0, %c0_i32 : i32, i32, i32
  }
}

</mosaic_0001>

<bundles_post_ra>
// kernel: tpu_custom_call.1
= control target key start
LH: loop header
LB: loop body
LE: loop exit
PB: predicated region body
PF: predicated region fallthrough
CT: control target
= control target key end

     0   :  { %s1393_s0 = inlined_call_operand.hbm [shape: f32[2,24,72], index: 0, kind: input, shape index: {}]   ;;  %s1394_s1 = inlined_call_operand.hbm [shape: f32[2,24,72], index: 1, kind: input, shape index: {}]   ;;  %s1395_s2 = inlined_call_operand.hbm [shape: f32[9,64], index: 2, kind: input, shape index: {}]   ;;  %s1396_s3 = inlined_call_operand.hbm [shape: bf16[64,128], index: 3, kind: input, shape index: {}]   ;;  %s1397_s4 = inlined_call_operand.vmem [shape: f32[1,128], index: 4, kind: input, shape index: {}]   ;;  %s1398_s5 = inlined_call_operand.hbm [shape: f32[2,16,128], index: 5, kind: output, shape index: {}]  }
   0x1   :  { %1404 = sst [smem:[#allocation19_spill]] %s1395_s2 }
   0x2   :  { %1405 = sst [smem:[#allocation20_spill]] %s1396_s3 }
   0x3   :  { %10 = vsyncpa [#allocation3], 0 }
   0x4   :  { %12 = vsyncpa [#allocation3 + $0x1], 0 }
   0x5   :  { %13 = vsyncpa [#allocation6], 0 }
   0x6   :  { %15 = vsyncpa [#allocation6 + $0x1], 0 }
   0x7   :  { %16 = vsyncpa [#allocation9], 0 }
   0x8   :  { %17 = vsyncpa [#allocation4], 0 }
   0x9   :  { %19 = vsyncpa [#allocation4 + $0x1], 0  ;;  %s1145_s18 = smov 0   ;;  %s1147_s19 = smov 0  }
   0xa   :  { %s1149_s20 = smov 0   ;;  %s1151_s21 = smov 0  }
   0xb   :  { %s1153_s22 = smov 0   ;;  %s1155_s23 = smov 0  }
   0xc LB: > { %1406 = sst [smem:[#allocation16_spill]] %s1098_s22  ;;  %s1176_s24 = sadd.s32 4294967295, %s1102_s23   ;;  %s1102_s23 = sphi %s1155_s23, %s25_s23   ;;  %s1098_s22 = sphi %s1153_s22, %s1420_s22   ;;  %s1094_s21 = sphi %s1151_s21, %s1419_s21   ;;  %s1090_s20 = sphi %s1149_s20, %s1423_s20   ;;  %s1086_s19 = sphi %s1147_s19, %s1422_s19   ;;  %s1082_s18 = sphi %s1145_s18, %s1421_s18  }
   0xd   : > { %s746_s25 = sadd.s32 4294967294, %s1102_s23   ;;  %p59_p0 = scmp.ne.s32.totalorder %s1086_s19, %s1082_s18 }
   0xe   : > { %p60_p1 = scmp.eq.s32.totalorder %s1176_s24, 0  ;;  %p180_p2 = scmp.eq.s32.totalorder %s1176_s24, 1 }
   0xf   : > { %p186_p3 = scmp.eq.s32.totalorder %s746_s25, 1  ;;  %p747_p5 = scmp.ge.s32.totalorder %s1102_s23, 1 }
  0x10   : > { %p1185_p4 = por %p60_p1, %p59_p0  ;;  %p193_p7 = scmp.lt.s32.totalorder %s1102_s23, 3 }
  0x11   : > { %p1190_p6 = por %p186_p3, %p59_p0  ;;  %s1410_s2 = sld [smem:[#allocation19_spill]] }
  0x12   : > { %p1198_p8 = pnand %p747_p5, %p193_p7  ;;  %s1104_s7 = smov [#allocation7]  }
  0x13   : > { %s1408_s27 = scalar_select %p1190_p6, 1, 0 }
  0x14   : > { %p803_p9 = pneg %p1198_p8  ;;  %s206_s8 = sshll.u32 %s1104_s7, 4  ;;  %s207_s8 = int_to_ptr.vmem [resolvable:$true] %s206_s8 }
  0x15   : > { %1409 = sst [smem:[#allocation17_spill]] %s1408_s27  ;;  %p750_p11 = scmp.ge.s32.totalorder %s1102_s23, 2 }
  0x16   : > { %p804_p10 = pnand %p803_p9, %p60_p1  ;;  %s1412_s3 = sld [smem:[#allocation20_spill]] }
  0x17   : > { %s204_s30 = sshll.u32 %s1410_s2, 4  ;;  %s1399_s12 = smov 128   ;;  %s205_s30 = int_to_ptr.hbm [resolvable:$true] %s204_s30 }
  0x18   : > { %s1400_s13 = smov 8   ;;  %s1107_s14 = smov [#allocation8]  }
  0x19   : > { %806 = dma.hbm_to_vmem [thread:$0]  (!%p804_p10), %s205_s30, 256, %s207_s8, [#allocation6], %s1399_s12, %s1399_s12, %s1400_s13  }
  0x1a   : > { %s220_s15 = sshll.u32 %s1107_s14, 4  ;;  %s1108_s16 = smov 64   ;;  %s221_s15 = int_to_ptr.vmem [resolvable:$true] %s220_s15 }
  0x1b   : > { %s1109_s17 = smov 4   ;;  %s34_s25 = sadd.s32 1, %s1098_s22 }
  0x1c   : > { %s218_s11 = sshll.u32 %s1412_s3, 4  ;;  %s46_s28 = sadd.s32 1, %s1090_s20  ;;  %s219_s11 = int_to_ptr.hbm [resolvable:$true] %s218_s11 }
  0x1d   : > { %809 = dma.hbm_to_vmem [thread:$0]  (!%p804_p10), %s219_s11, 512, %s221_s15, [#allocation9], %s1108_s16, %s1108_s16, %s1109_s17  }
  0x1e   : > { %p35_p12 = scmp.ge.s32.totalorder %s34_s25, 2  ;;  %p53_p13 = scmp.ne.s32.totalorder %s1090_s20, %s1086_s19 }
  0x1f   : > { %p54_p0 = scmp.eq.s32.totalorder %s1102_s23, 0  ;;  %p823_p3 = scmp.lt.s32.totalorder %s1102_s23, 2 }
  0x20   : > { %s1425_s25 = smov (%p35_p12, %s34_s25), 0  ;;  %p1227_p7 = por %p180_p2, %p53_p13 }
  0x21   : > { %1413 = sst [smem:[#allocation18_spill]] %s1425_s25  ;;  %p1221_p5 = por %p54_p0, %p53_p13 }
  0x22   : > { %s41_s7 = ssub.s32 %s1098_s22, %s1425_s25  ;;  %s237_s8 = sand.u32 1, %s1090_s20  }
  0x23   : > { %p44_p9 = scmp.eq.s32.totalorder %s41_s7, 0  ;;  %s751_s9 = sshll.u32 %s237_s8, 4 }
  0x24   : > { %s788_s10 = smul.u32 24, %s1098_s22  ;;  %s241_s12 = scalar_lea.vmem [#allocation2], %s751_s9 }
  0x25   : > { %s1236_s11 = scalar_select %p44_p9, %s1090_s20, %s46_s28  }
  0x26   : > { %s254_s16 = scalar_lea.hbm %s1393_s0, %s788_s10  ;;  %s258_s13 = sshll.u32 %s241_s12, 4  ;;  %s259_s13 = int_to_ptr.vmem [resolvable:$true] %s258_s13 }
  0x27   : > { %s256_s17 = sshll.u32 %s254_s16, 4  ;;  %p811_p2 = pnand %p823_p3, %p1221_p5  ;;  %s257_s17 = int_to_ptr.hbm [resolvable:$true] %s256_s17 }
  0x28   : > { %s268_s2 = sand.u32 1, %s1102_s23   ;;  %s753_s3 = sshll.u32 %s237_s8, 3 }
  0x29   : > { %s238_s25 = scalar_lea.sflag [#allocation3], %s237_s8  ;;  %s1416_s7 = smov 8  }
  0x2a   : > { %s1417_s27 = smov 128   ;;  %s658_s14 = scalar_lea.hbm %s1394_s1, %s788_s10 }
  0x2b   : > { %813 = dma.hbm_to_vmem [thread:$0]  (!%p811_p2), %s257_s17, 256, %s259_s13, %s238_s25, %s1417_s27, %s1417_s27, %s1416_s7  }
  0x2c   : > { %s272_s15 = scalar_lea.vmem [#allocation5], %s753_s3  ;;  %s659_s9 = scalar_lea.hbm %s658_s14, 16 }
  0x2d   : > { %s284_s16 = sshll.u32 %s272_s15, 4  ;;  %s282_s12 = sshll.u32 %s659_s9, 4  ;;  %s285_s16 = int_to_ptr.vmem [resolvable:$true] %s284_s16  ;;  %s283_s12 = int_to_ptr.hbm [resolvable:$true] %s282_s12 }
  0x2e   : > { %s269_s29 = scalar_lea.sflag [#allocation6], %s268_s2  ;;  %293 = sbr.rel (%p1198_p8) target bundleno = 467 (0x1d3), region = 40 }
  0x2f   : > { %816 = dma.hbm_to_vmem [thread:$0]  (!%p811_p2), %s283_s12, 128, %s285_s16, %s269_s29  }
  0x30   : > { %s1255_s8 = sand.u32 (!%p1198_p8), 1, %s1086_s19  }
  0x31   : > { %s756_s22 = sshll.u32 (!%p1198_p8), %s1255_s8, 4  ;;  %s296_s27 = scalar_lea.sflag (!%p1198_p8), [#allocation3], %s1255_s8 }
  0x32   : > { %s299_s3 = scalar_lea.vmem (!%p1198_p8), [#allocation2], %s756_s22 }
  0x33   : > { %1061 = dma.done.wait (%p1185_p4), %s296_s27, 256  }
  0x34   : > { %1063 = vsyncadd (%p1185_p4), %s296_s27, 4294967040  ;;  %s305_s2 = sand.u32 1, %s1176_s24   ;;  %s757_s6 = sshll.u32 %s1255_s8, 3 }
  0x35   : > { %s306_s13 = scalar_lea.sflag [#allocation6], %s305_s2  ;;  %s1267_s25 = scalar_lea.vmem [#allocation5], %s757_s6 }
  0x36   : > { %1065 = dma.done.wait (%p1185_p4), %s306_s13, 128  }
  0x37   : > { %1067 = vsyncadd (%p1185_p4), %s306_s13, 4294967168 }
  0x38   : > { %1069 = dma.done.wait (%p60_p1), [#allocation6], 256  }
  0x39   : > { %1071 = vsyncadd (%p60_p1), [#allocation6], 4294967040 }
  0x3a   : > { %1073 = dma.done.wait (%p60_p1), [#allocation9], 512  }
  0x3b   : > { %1075 = vsyncadd (%p60_p1), [#allocation9], 4294966784  ;;  %v1281_v0 = vld [vmem:[#allocation7] sm:$0xff]  ;;  %s1110_s26 = smov 4   ;;  %v886_v6 = vld [vmem:[#allocation7 + $0x8] ss:$0 sm:$0xff] }
  0x3c   : > { %v371_v1 = vperm.slane %v1281_v0, 1  ;;  %v422_v2 = vperm.slane %v1281_v0, 4  ;;  %v487_v3 = vperm.slane %v1281_v0, 7  ;;  %v388_v4 = vperm.slane %v1281_v0, 2  ;;  %s1111_s10 = smov 8   ;;  %v1291_v7 = vld [vmem:[%s299_s3] sm:$0xff] }
  0x3d   : > { %v446_v5 = vperm.slane %v1281_v0, 5  ;;  %v1293_v8 = vld [vmem:[%s299_s3 + $0x8] sm:$0xff]  ;;  %s1112_s24 = smov 124   ;;  %vm412_vm0 = vcmask 1046528   ;;  %v1302_v18 = vld [vmem:[%s1267_s25] sm:$0x3] }
  0x3e   : > { %373 = vrot.lane.b32.xlu0 %v371_v1, %s1110_s26  ;;  %424 = vrot.lane.b32.xlu1 %v422_v2, %s1110_s26  ;;  %s1113_s17 = smov 120   ;;  %vm477_vm1 = vcmask 1045504   ;;  %v786_v52 = vld [vmem:[#allocation8 + $0x18] sm:$0xff]  ;;  %v785_v53 = vld [vmem:[#allocation8 + $0x10] sm:$0xff]  ;;  %v784_v54 = vld [vmem:[#allocation8 + $0x8] sm:$0xff]  ;;  %v366_v57 = vperm.slane %v1281_v0, 0 }
  0x3f   : > { %489 = vrot.lane.b32.xlu2 %v487_v3, %s1110_s26  ;;  %580 = vmatpush.bf16.msra.mxu0 %v786_v52  ;;  %v783_v55 = vld [vmem:[#allocation8] sm:$0xff]  ;;  %v405_v58 = vperm.slane %v1281_v0, 3  ;;  %vm572_vm2 = vcmask 523264   ;;  %s787_s14 = sshll.u32 %s1094_s21, 4  ;;  %s351_s15 = scalar_lea.vmem [#allocation10], %s756_s22 }
  0x40   : > { %v367_v61 = vmul.f32 %v366_v57, %v1291_v7  ;;  %v368_v2 = vmul.f32 %v366_v57, %v1293_v8  ;;  %s608_s12 = scalar_lea.hbm %s1398_s5, %s787_s14  ;;  %s609_s29 = sshll.u32 %s351_s15, 4  ;;  %s610_s29 = int_to_ptr.vmem [resolvable:$true] %s609_s29 }
  0x41   : > { %v407_v62 = vmul.f32 %v405_v58, %v1293_v8  ;;  %v406_v63 = vmul.f32 %v405_v58, %v1291_v7  ;;  %v408_v1 = vmul.f32 %v405_v58, %v1302_v18  ;;  %s611_s27 = sshll.u32 %s608_s12, 4  ;;  %s595_s3 = scalar_lea.sflag [#allocation4], %s1255_s8  ;;  %s612_s27 = int_to_ptr.hbm [resolvable:$true] %s611_s27 }
  0x42   : > { %s1022_s2 = sshra.s32 %s612_s27, 4  ;;  %s1028_s13 = scalar_lea.hbm %s1398_s5, 32  ;;  %s1023_s2 = int_to_ptr.hbm [resolvable:$true] %s1022_s2 }
  0x43   : > { %581 = vmatpush.bf16.msra.mxu0 %v785_v53  ;;  %s1024_s21 = scalar_lea.hbm %s1023_s2, 16  ;;  %p1029_p10 = scmp.lt.s32.totalorder %s1023_s2, %s1398_s5 }
  0x44   : > { %p1025_p1 = scmp.ne.s32.totalorder %s1023_s2, %s1024_s21  ;;  %p1030_p12 = scmp.lt.s32.totalorder %s1028_s13, %s1024_s21 }
  0x46   : > { %390 = vrot.lane.b32.xlu0 %v388_v4, %s1111_s10  ;;  %448 = vrot.lane.b32.xlu1 %v446_v5, %s1111_s10  ;;  %v414_v5 = vrot.slane %v407_v62, 1  ;;  %p1026_p4 = pnand %p1025_p1, %p1227_p7  ;;  %p1031_p13 = por %p1030_p12, %p1029_p10 }
  0x47   : > { %513 = vrot.lane.b32.xlu2 %v886_v6, %s1111_s10  ;;  %582 = vmatpush.bf16.msra.mxu0 %v784_v54  ;;  %v413_v6 = vrot.slane %v406_v63, 1 }
  0x48   : > { %p1027_p8 = pneg %p1026_p4 }
  0x4a   : > { %p1032_p0 = pnand %p1031_p13, %p1027_p8 }
  0x4b   : > { %583 = vmatpush.bf16.msra.mxu0 %v783_v55 }
  0x99   : > { %v490_v15 = vpop.permute.xlu2 %489 }
  0x9a   : > { %v492_v37 = vmul.f32 %v490_v15, %v1291_v7  ;;  %v493_v38 = vmul.f32 %v490_v15, %v1293_v8  ;;  %v494_v40 = vmul.f32 %v490_v15, %v1302_v18 }
  0x9c   : > { %v498_v43 = vrot.slane %v492_v37, 2  ;;  %v499_v44 = vrot.slane %v493_v38, 2  ;;  %v501_v45 = vrot.slane %v494_v40, 2 }
  0x9e   : > { %v500_v48 = vsel %vm477_vm1, %v498_v43, %v499_v44  ;;  %v502_v49 = vsel %vm477_vm1, %v499_v44, %v501_v45 }
  0xa1   : > { %v514_v31 = vpop.permute.xlu2 %513 }
  0xa2   : > { %v516_v34 = vmul.f32 %v514_v31, %v1291_v7  ;;  %v517_v35 = vmul.f32 %v514_v31, %v1293_v8  ;;  %v518_v47 = vmul.f32 %v514_v31, %v1302_v18 }
  0xa4   : > { %v522_v41 = vrot.slane %v516_v34, 2  ;;  %v523_v42 = vrot.slane %v517_v35, 2  ;;  %v525_v50 = vrot.slane %v518_v47, 2 }
  0xa6   : > { %v524_v46 = vsel %vm477_vm1, %v522_v41, %v523_v42  ;;  %v526_v51 = vsel %vm477_vm1, %v523_v42, %v525_v50  ;;  %v887_v42 = vld [vmem:[%s1397_s4] ss:$0 sm:$0xff] }
  0xb0   : > { %v374_v9 = vpop.permute.xlu0 %373  ;;  %v425_v10 = vpop.permute.xlu1 %424 }
  0xb1   : > { %v376_v11 = vmul.f32 %v374_v9, %v1291_v7  ;;  %v377_v12 = vmul.f32 %v374_v9, %v1293_v8  ;;  %v427_v13 = vmul.f32 %v425_v10, %v1291_v7  ;;  %v428_v14 = vmul.f32 %v425_v10, %v1293_v8 }
  0xb2   : > { %v429_v26 = vmul.f32 %v425_v10, %v1302_v18  ;;  %v416_v9 = vrot.slane %v408_v1, 1  ;;  %v470_v10 = vperm.slane %v1281_v0, 6 }
  0xb3   : > { %382 = vrot.lane.b32.xlu1 %v377_v12, %s1112_s24  ;;  %380 = vrot.lane.b32.xlu0 %v376_v11, %s1112_s24  ;;  %v433_v16 = vrot.slane %v427_v13, 1  ;;  %v434_v17 = vrot.slane %v428_v14, 1 }
  0xb4   : > { %v436_v32 = vrot.slane %v429_v26, 1 }
  0xb5   : > { %v435_v20 = vsel %vm412_vm0, %v433_v16, %v434_v17  ;;  %v415_v16 = vsel %vm412_vm0, %v413_v6, %v414_v5 }
  0xb6   : > { %v437_v39 = vsel %vm412_vm0, %v434_v17, %v436_v32  ;;  %v417_v17 = vsel %vm412_vm0, %v414_v5, %v416_v9 }
  0xb8   : > { %v391_v19 = vpop.permute.xlu0 %390  ;;  %v449_v21 = vpop.permute.xlu1 %448 }
  0xb9   : > { %v393_v22 = vmul.f32 %v391_v19, %v1291_v7  ;;  %v394_v23 = vmul.f32 %v391_v19, %v1293_v8  ;;  %v451_v24 = vmul.f32 %v449_v21, %v1291_v7  ;;  %v452_v25 = vmul.f32 %v449_v21, %v1293_v8 }
  0xba   : > { %v453_v27 = vmul.f32 %v449_v21, %v1302_v18  ;;  %v471_v19 = vmul.f32 %v470_v10, %v1291_v7  ;;  %v473_v21 = vmul.f32 %v470_v10, %v1302_v18 }
  0xbb   : > { %438 = vrot.lane.b32.xlu1 %v435_v20, %s1112_s24  ;;  %397 = vrot.lane.b32.xlu2 %v393_v22, %s1113_s17  ;;  %v458_v28 = vrot.slane %v452_v25, 1  ;;  %v457_v30 = vrot.slane %v451_v24, 1  ;;  %v472_v20 = vmul.f32 %v470_v10, %v1293_v8 }
  0xbc   : > { %399 = vrot.lane.b32.xlu0 %v394_v23, %s1113_s17  ;;  %v460_v29 = vrot.slane %v453_v27, 1  ;;  %v478_v24 = vrot.slane %v471_v19, 2 }
  0xbd   : > { %v459_v36 = vsel %vm412_vm0, %v457_v30, %v458_v28  ;;  %v479_v25 = vrot.slane %v472_v20, 2 }
  0xbe   : > { %v461_v33 = vsel %vm412_vm0, %v458_v28, %v460_v29  ;;  %v481_v29 = vrot.slane %v473_v21, 2 }
  0xbf   : > { %v480_v32 = vsel %vm477_vm1, %v478_v24, %v479_v25 }
  0xc0   : > { %v482_v7 = vsel %vm477_vm1, %v479_v25, %v481_v29 }
  0xc3   : > { %464 = vrot.lane.b32.xlu1 %v461_v33, %s1113_s17  ;;  %440 = vrot.lane.b32.xlu2 %v437_v39, %s1112_s24 }
  0xc4   : > { %462 = vrot.lane.b32.xlu0 %v459_v36, %s1113_s17 }
  0xcb   : > { %527 = vrot.lane.b32.xlu1 %v524_v46, %s1113_s17  ;;  %503 = vrot.lane.b32.xlu2 %v500_v48, %s1112_s24 }
  0xcc   : > { %505 = vrot.lane.b32.xlu0 %v502_v49, %s1112_s24 }
  0xd3   : > { %529 = vrot.lane.b32.xlu2 %v526_v51, %s1113_s17 }
 0x115   : > { %v398_v56 = vpop.permute.xlu2 %397 }
 0x11d   : > { %v441_v4 = vpop.permute.xlu2 %440 }
 0x125   : > { %v383_v59 = vpop.permute.xlu1 %382  ;;  %v381_v60 = vpop.permute.xlu0 %380 }
 0x126   : > { %v386_v3 = vadd.f32 %v381_v60, %v367_v61  ;;  %v387_v11 = vadd.f32 %v383_v59, %v368_v2  ;;  %v504_v27 = vpop.permute.xlu2 %503 }
 0x128   : > { %v403_v14 = vadd.f32 %v398_v56, %v386_v3 }
 0x12a   : > { %v420_v22 = vadd.f32 %v415_v16, %v403_v14 }
 0x12d   : > { %v439_v12 = vpop.permute.xlu1 %438 }
 0x12e   : > { %v400_v13 = vpop.permute.xlu0 %399  ;;  %v444_v0 = vadd.f32 %v439_v12, %v420_v22  ;;  %v530_v38 = vpop.permute.xlu2 %529 }
 0x12f   : > { %v404_v15 = vadd.f32 %v400_v13, %v387_v11 }
 0x131   : > { %v421_v23 = vadd.f32 %v417_v17, %v404_v15 }
 0x133   : > { %v445_v31 = vadd.f32 %v441_v4, %v421_v23 }
 0x135   : > { %v465_v26 = vpop.permute.xlu1 %464 }
 0x136   : > { %v463_v28 = vpop.permute.xlu0 %462  ;;  %v469_v33 = vadd.f32 %v465_v26, %v445_v31 }
 0x137   : > { %v468_v30 = vadd.f32 %v463_v28, %v444_v0 }
 0x138   : > { %v486_v34 = vadd.f32 %v482_v7, %v469_v33 }
 0x139   : > { %v485_v8 = vadd.f32 %v480_v32, %v468_v30 }
 0x13b   : > { %v509_v37 = vadd.f32 %v504_v27, %v485_v8 }
 0x13d   : > { %v528_v35 = vpop.permute.xlu1 %527 }
 0x13e   : > { %v506_v18 = vpop.permute.xlu0 %505  ;;  %v533_v40 = vadd.f32 %v528_v35, %v509_v37 }
 0x13f   : > { %v510_v36 = vadd.f32 %v506_v18, %v486_v34 }
 0x141   : > { %v534_v39 = vadd.f32 %v530_v38, %v510_v36 }
 0x143   : > { %v535_v41 = vpack.c.bf16 %v534_v39, %v533_v40 }
 0x145   : > { %777 = vmatmul.msk.bf16.vlgmr.msra.gmra.mxu0 %vm572_vm2, %v535_v41 }
 0x1c2   : > { %v585_v43 = vpop.f32.mrf.mxu0 }
 0x1c3   : > { %v586_v44 = vadd.f32 %v887_v42, %v585_v43 }
 0x1c5   : > { %v590_v45 = vmax.f32 %v586_v44, 0.0 }
 0x1c7   : > { %592 = vst [vmem:[%s351_s15] sm:$0xff] %v590_v45 }
 0x1ca   : > { %v587_v46 = vpop.f32.mrf.mxu0 }
 0x1cb   : > { %v588_v47 = vadd.f32 %v887_v42, %v587_v46 }
 0x1cd   : > { %v591_v48 = vmax.f32 %v588_v47, 0.0 }
 0x1cf   : > { %593 = vst [vmem:[%s351_s15 + $0x8] sm:$0xff] %v591_v48 }
 0x1d0   : > { %1035 = shalt.err (!%p1032_p0)
}
 0x1d1   : > { %s1114_s8 = smov 128  }
 0x1d2   : > { %801 = dma.vmem_to_hbm [thread:$0]  (%p1227_p7), %s610_s29, 256, %s612_s27, %s595_s3, %s1114_s8, %s1114_s8, %s1111_s10  }
 0x1d3 PF: > { %s626_s17 = sand.u32 1, %s1082_s18   ;;  %p818_p3 = pnand %p750_p11, %p1190_p6 }
 0x1d4   : > { %s627_s7 = scalar_lea.sflag [#allocation4], %s626_s17 }
 0x1d5   : > { %p819_p5 = pneg %p818_p3 }
 0x1d7   : > { %1077 = dma.done.wait (%p819_p5), %s627_s7, 256  }
 0x1d8   : > { %1079 = vsyncadd (%p819_p5), %s627_s7, 4294967040  ;;  %s25_s23 = sadd.s32 1, %s1102_s23   ;;  %s1419_s21 = sld [smem:[#allocation16_spill]] }
 0x1d9   : > { %p22_p9 = scmp.ge.s32.totalorder %s25_s23, 4   ;;  %s1420_s22 = sld [smem:[#allocation18_spill]] }
 0x1da   : > { %s1421_s18 = smov %s1086_s19  ;;  %s1422_s19 = smov %s1090_s20 }
 0x1db   : > { %s1423_s20 = smov %s1236_s11  ;;  %24 = sbr.rel (!%p22_p9) target bundleno = 12 (0xc), region = 106 }
 0x1e0   :  { %633 = vsyncpa [#allocation3], 1 }
 0x1e1   :  { %635 = vsyncpa [#allocation3 + $0x1], 1 }
 0x1e2   :  { %636 = vsyncpa [#allocation6], 1 }
 0x1e3   :  { %638 = vsyncpa [#allocation6 + $0x1], 1 }
 0x1e4   :  { %639 = vsyncpa [#allocation9], 1 }
 0x1e5   :  { %640 = vsyncpa [#allocation4], 1 }
 0x1e6   :  { %642 = vsyncpa [#allocation4 + $0x1], 1 }

</bundles_post_ra>
